<compile_context>
chip_gen: v6e
topology: v6e:2x2x1
jax: 0.10.0
libtpu: 0.0.40
codegen_flags: <defaults>
</compile_context>

<pallas_src>
import functools

import jax
import jax.numpy as jnp
from jax.experimental import pallas as pl
from jax.experimental.pallas import tpu as pltpu


D_IN, D_HID, D_OUT = 2, 128, 1
TILE_B_MAX = 512  # rows per grid step; multiple of 8, small enough for v5e's
                  # 16 MiB scoped-VMEM default and v7x's 64 MiB physical VMEM.


def _round_up(n, m):
    return ((n + m - 1) // m) * m


def _hash_u32(x):
    """Cheap 32-bit integer hash (xorshift-multiply), uint32 in/out."""
    x = x ^ (x >> 16)
    x = x * jnp.uint32(0x7FEB352D)
    x = x ^ (x >> 15)
    x = x * jnp.uint32(0x846CA68B)
    x = x ^ (x >> 16)
    return x


def _dropout_bits(seed_u32, row_offset, salt, shape):
    """Per-element pseudo-random uint32, keyed by (seed, global position, salt)."""
    rows = jax.lax.broadcasted_iota(jnp.int32, shape, 0) + row_offset
    cols = jax.lax.broadcasted_iota(jnp.int32, shape, 1)
    idx = (rows * shape[1] + cols).astype(jnp.uint32)
    return _hash_u32(idx ^ (seed_u32 * jnp.uint32(0x9E3779B1)) ^ jnp.uint32(salt))


def ann_kernel(seed_ref, x_ref, w1_ref, b1_ref, w2_ref, b2_ref, w3_row_ref,
               b3_ref, o_ref, *, p, training, tile_b):
    use_dropout = bool(training) and p > 0.0
    drop_all = use_dropout and p >= 1.0

    if use_dropout and not drop_all:
        seed_u32 = seed_ref[0].astype(jnp.uint32)
        row_off = pl.program_id(0) * tile_b
        thresh = jnp.uint32(min(int(p * (2 ** 32)), 2 ** 32 - 1))
        scale = jnp.float32(1.0 / (1.0 - p))

    # ---- Layer 1: Linear(2, 128) on the VPU (K=2 matmul wastes an MXU push).
    x = x_ref[...]                                     # (tile_b, 2)
    w1 = w1_ref[...]                                   # (2, 128)
    pre1 = x[:, 0:1] * w1[0:1, :] + x[:, 1:2] * w1[1:2, :] + b1_ref[...]

    if drop_all:
        h1 = jnp.zeros_like(pre1)
    elif use_dropout:
        bits1 = _dropout_bits(seed_u32, row_off, 0x9E3779B9, pre1.shape)
        # Fused ReLU + inverted dropout.
        h1 = jnp.where((bits1 >= thresh) & (pre1 > 0.0), pre1 * scale, 0.0)
    else:
        h1 = jnp.maximum(pre1, 0.0)

    # ---- Layer 2: Linear(128, 128) — the only real MXU matmul.
    pre2 = (jnp.dot(h1, w2_ref[...], preferred_element_type=jnp.float32)
            + b2_ref[...])

    if drop_all:
        h2 = jnp.zeros_like(pre2)
    elif use_dropout:
        bits2 = _dropout_bits(seed_u32, row_off, 0x85EBCA6B, pre2.shape)
        h2 = jnp.where((bits2 >= thresh) & (pre2 > 0.0), pre2 * scale, 0.0)
    else:
        h2 = jnp.maximum(pre2, 0.0)

    # ---- Output layer: Linear(128, 1) as VPU multiply + lane reduction
    # (an N=1 MXU push would cost the same as the full layer-2 push).
    o_ref[...] = (jnp.sum(h2 * w3_row_ref[...], axis=-1, keepdims=True)
                  + b3_ref[...])


def ann_forward(x, params, *, dropout_rate, seed, training=True, tile_b=None):
    """Full ANNModel forward pass in a single batch-tiled Pallas kernel."""
    w1, b1, w2, b2, w3, b3 = params
    B = x.shape[0]

    if tile_b is None:
        tile_b = min(TILE_B_MAX, _round_up(B, 8))
    tile_b = max(8, _round_up(tile_b, 8))

    # Pad the batch to a multiple of the tile; padded rows are sliced off.
    Bp = _round_up(B, tile_b)
    if Bp != B:
        x = jnp.pad(x, ((0, Bp - B), (0, 0)))
    grid_b = Bp // tile_b

    w3_row = w3.reshape(1, D_HID)  # (D_HID, 1) -> (1, D_HID), lane-major in kernel

    kernel = functools.partial(ann_kernel, p=float(dropout_rate),
                               training=bool(training), tile_b=int(tile_b))

    out = pl.pallas_call(
        kernel,
        out_shape=jax.ShapeDtypeStruct((Bp, D_OUT), jnp.float32),
        grid_spec=pltpu.PrefetchScalarGridSpec(
            num_scalar_prefetch=1,                    # seed lands in SMEM
            grid=(grid_b,),
            in_specs=[
                pl.BlockSpec((tile_b, D_IN),     lambda i, s: (i, 0)),
                pl.BlockSpec((D_IN, D_HID),      lambda i, s: (0, 0)),
                pl.BlockSpec((1, D_HID),         lambda i, s: (0, 0)),
                pl.BlockSpec((D_HID, D_HID),     lambda i, s: (0, 0)),
                pl.BlockSpec((1, D_HID),         lambda i, s: (0, 0)),
                pl.BlockSpec((1, D_HID),         lambda i, s: (0, 0)),
                pl.BlockSpec((1, D_OUT),         lambda i, s: (0, 0)),
            ],
            out_specs=pl.BlockSpec((tile_b, D_OUT), lambda i, s: (i, 0)),
        ),
        compiler_params=pltpu.CompilerParams(
            dimension_semantics=("parallel",)),
    )(jnp.asarray([seed], dtype=jnp.int32), x, w1, b1, w2, b2, w3_row, b3)

    return out[:B]


def ann_reference(x, params):
    """Pure-JAX eval-mode (no dropout) reference for correctness checking."""
    w1, b1, w2, b2, w3, b3 = params
    h = jnp.maximum(x @ w1 + b1, 0.0)
    h = jnp.maximum(h @ w2 + b2, 0.0)
    return h @ w3 + b3


def init_params(key):
    """Deterministic init mimicking PyTorch Linear's U(-1/sqrt(fan_in), ...)."""
    ks = jax.random.split(key, 6)

    def uniform(k, shape, fan_in):
        bound = 1.0 / jnp.sqrt(jnp.float32(fan_in))
        return jax.random.uniform(k, shape, jnp.float32, -bound, bound)

    w1 = uniform(ks[0], (D_IN, D_HID), D_IN)
    b1 = uniform(ks[1], (1, D_HID), D_IN)
    w2 = uniform(ks[2], (D_HID, D_HID), D_HID)
    b2 = uniform(ks[3], (1, D_HID), D_HID)
    w3 = uniform(ks[4], (D_HID, D_OUT), D_HID)
    b3 = uniform(ks[5], (1, D_OUT), D_HID)
    return (w1, b1, w2, b2, w3, b3)


if __name__ == "__main__":
    key = jax.random.PRNGKey(0)
    k_params, k_x = jax.random.split(key)

    params = init_params(k_params)

    batch = 8
    x = jax.random.normal(k_x, (batch, D_IN), dtype=jnp.float32)

    # Eval mode (dropout off): must match the pure-JAX reference.
    out_eval = ann_forward(x, params, dropout_rate=0.5, seed=1234,
                           training=False)
    out_eval = jax.block_until_ready(out_eval)
    ref = ann_reference(x, params)
    assert out_eval.shape == (batch, D_OUT), out_eval.shape
    assert jnp.allclose(out_eval, ref, rtol=5e-2, atol=5e-2), (
        "eval-mode mismatch", out_eval, ref)

    # Training mode (dropout on): shape/dtype/finiteness sanity checks.
    out_train = ann_forward(x, params, dropout_rate=0.5, seed=1234,
                            training=True)
    out_train = jax.block_until_ready(out_train)
    assert out_train.shape == (batch, D_OUT), out_train.shape
    assert out_train.dtype == jnp.float32, out_train.dtype
    assert bool(jnp.all(jnp.isfinite(out_train)))

    print("KERNEL_OK")
</pallas_src>

<mosaic_0001>
module attributes {stable_mosaic.version = 11 : i64} {
  func.func @ann_kernel(%arg0: i32, %arg1: memref<1xi32, #tpu.memory_space<smem>>, %arg2: memref<8x2xf32, #tpu.memory_space<vmem>>, %arg3: memref<2x128xf32, #tpu.memory_space<vmem>>, %arg4: memref<1x128xf32, #tpu.memory_space<vmem>>, %arg5: memref<128x128xf32, #tpu.memory_space<vmem>>, %arg6: memref<1x128xf32, #tpu.memory_space<vmem>>, %arg7: memref<1x128xf32, #tpu.memory_space<vmem>>, %arg8: memref<1x1xf32, #tpu.memory_space<vmem>>, %arg9: memref<8x1xf32, #tpu.memory_space<vmem>>) attributes {dimension_semantics = [#tpu.dimension_semantics<parallel>], iteration_bounds = array<i64: 1>, scalar_prefetch = 1 : i64, scratch_operands = 0 : i64, tpu.core_type = #tpu.core_type<tc>, window_params = [{transform_indices = @transform_0, window_bounds = array<i64: 8, 2>}, {pipeline_mode = #tpu.pipeline_mode<synchronous>, transform_indices = @transform_1, window_bounds = array<i64: 2, 128>}, {pipeline_mode = #tpu.pipeline_mode<synchronous>, transform_indices = @transform_2, window_bounds = array<i64: 1, 128>}, {pipeline_mode = #tpu.pipeline_mode<synchronous>, transform_indices = @transform_3, window_bounds = array<i64: 128, 128>}, {pipeline_mode = #tpu.pipeline_mode<synchronous>, transform_indices = @transform_4, window_bounds = array<i64: 1, 128>}, {pipeline_mode = #tpu.pipeline_mode<synchronous>, transform_indices = @transform_5, window_bounds = array<i64: 1, 128>}, {pipeline_mode = #tpu.pipeline_mode<synchronous>, transform_indices = @transform_6, window_bounds = array<i64: 1, 1>}, {transform_indices = @transform_7, window_bounds = array<i64: 8, 1>}]} {
    %c0 = arith.constant 0 : index
    %c0_0 = arith.constant 0 : index
    %0 = vector.load %arg2[%c0, %c0_0] : memref<8x2xf32, #tpu.memory_space<vmem>>, vector<8x2xf32>
    %c0_1 = arith.constant 0 : index
    %c0_2 = arith.constant 0 : index
    %1 = vector.load %arg3[%c0_1, %c0_2] : memref<2x128xf32, #tpu.memory_space<vmem>>, vector<2x128xf32>
    %2 = vector.extract_strided_slice %0 {offsets = [0, 0], sizes = [8, 1], strides = [1, 1]} : vector<8x2xf32> to vector<8x1xf32>
    %3 = vector.extract_strided_slice %1 {offsets = [0, 0], sizes = [1, 128], strides = [1, 1]} : vector<2x128xf32> to vector<1x128xf32>
    %4 = vector.broadcast %2 : vector<8x1xf32> to vector<8x128xf32>
    %5 = vector.broadcast %3 : vector<1x128xf32> to vector<8x128xf32>
    %6 = arith.mulf %4, %5 : vector<8x128xf32>
    %7 = vector.extract_strided_slice %0 {offsets = [0, 1], sizes = [8, 1], strides = [1, 1]} : vector<8x2xf32> to vector<8x1xf32>
    %8 = vector.extract_strided_slice %1 {offsets = [1, 0], sizes = [1, 128], strides = [1, 1]} : vector<2x128xf32> to vector<1x128xf32>
    %9 = vector.broadcast %7 : vector<8x1xf32> to vector<8x128xf32>
    %10 = vector.broadcast %8 : vector<1x128xf32> to vector<8x128xf32>
    %11 = arith.mulf %9, %10 : vector<8x128xf32>
    %12 = arith.addf %6, %11 : vector<8x128xf32>
    %c0_3 = arith.constant 0 : index
    %c0_4 = arith.constant 0 : index
    %13 = vector.load %arg4[%c0_3, %c0_4] : memref<1x128xf32, #tpu.memory_space<vmem>>, vector<1x128xf32>
    %14 = vector.broadcast %13 : vector<1x128xf32> to vector<8x128xf32>
    %15 = arith.addf %12, %14 : vector<8x128xf32>
    %cst = arith.constant 0.000000e+00 : f32
    %16 = vector.broadcast %cst : f32 to vector<8x128xf32>
    %17 = arith.maximumf %15, %16 : vector<8x128xf32>
    %c0_5 = arith.constant 0 : index
    %c0_6 = arith.constant 0 : index
    %18 = vector.load %arg5[%c0_5, %c0_6] : memref<128x128xf32, #tpu.memory_space<vmem>>, vector<128x128xf32>
    %cst_7 = arith.constant dense<0.000000e+00> : vector<8x128xf32>
    %19 = tpu.matmul %17, %18, %cst_7 {dimension_numbers = #tpu.dot_dimension_numbers<[1], [0], [0], [1], [0, 0, 1, 1], [], []>} : vector<8x128xf32>, vector<128x128xf32>, vector<8x128xf32> -> vector<8x128xf32>
    %c0_8 = arith.constant 0 : index
    %c0_9 = arith.constant 0 : index
    %20 = vector.load %arg6[%c0_8, %c0_9] : memref<1x128xf32, #tpu.memory_space<vmem>>, vector<1x128xf32>
    %21 = vector.broadcast %20 : vector<1x128xf32> to vector<8x128xf32>
    %22 = arith.addf %19, %21 : vector<8x128xf32>
    %cst_10 = arith.constant 0.000000e+00 : f32
    %23 = vector.broadcast %cst_10 : f32 to vector<8x128xf32>
    %24 = arith.maximumf %22, %23 : vector<8x128xf32>
    %c0_11 = arith.constant 0 : index
    %c0_12 = arith.constant 0 : index
    %25 = vector.load %arg7[%c0_11, %c0_12] : memref<1x128xf32, #tpu.memory_space<vmem>>, vector<1x128xf32>
    %26 = vector.broadcast %25 : vector<1x128xf32> to vector<8x128xf32>
    %27 = arith.mulf %24, %26 : vector<8x128xf32>
    %cst_13 = arith.constant dense<0.000000e+00> : vector<8xf32>
    %28 = vector.multi_reduction <add>, %27, %cst_13 [1] : vector<8x128xf32> to vector<8xf32>
    %29 = vector.shape_cast %28 : vector<8xf32> to vector<8x1xf32>
    %c0_14 = arith.constant 0 : index
    %c0_15 = arith.constant 0 : index
    %30 = vector.load %arg8[%c0_14, %c0_15] : memref<1x1xf32, #tpu.memory_space<vmem>>, vector<1x1xf32>
    %31 = vector.broadcast %30 : vector<1x1xf32> to vector<8x1xf32>
    %32 = arith.addf %29, %31 : vector<8x1xf32>
    %c0_16 = arith.constant 0 : index
    %c0_17 = arith.constant 0 : index
    %33 = vector.load %arg9[%c0_16, %c0_17] : memref<8x1xf32, #tpu.memory_space<vmem>>, vector<8x1xf32>
    tpu.vector_store %arg9[%c0_16, %c0_17], %32 {strides = array<i32>} : memref<8x1xf32, #tpu.memory_space<vmem>>, vector<8x1xf32>,
    return
  }
  func.func @transform_0(%arg0: i32, %arg1: memref<1xi32, #tpu.memory_space<smem>>) -> (i32, i32) {
    %c0_i32 = arith.constant 0 : i32
    %c0_i32_0 = arith.constant 0 : i32
    return %arg0, %c0_i32 : i32, i32
  }
  func.func @transform_1(%arg0: i32, %arg1: memref<1xi32, #tpu.memory_space<smem>>) -> (i32, i32) {
    %c0_i32 = arith.constant 0 : i32
    %c0_i32_0 = arith.constant 0 : i32
    %c0_i32_1 = arith.constant 0 : i32
    return %c0_i32, %c0_i32_0 : i32, i32
  }
  func.func @transform_2(%arg0: i32, %arg1: memref<1xi32, #tpu.memory_space<smem>>) -> (i32, i32) {
    %c0_i32 = arith.constant 0 : i32
    %c0_i32_0 = arith.constant 0 : i32
    %c0_i32_1 = arith.constant 0 : i32
    return %c0_i32, %c0_i32_0 : i32, i32
  }
  func.func @transform_3(%arg0: i32, %arg1: memref<1xi32, #tpu.memory_space<smem>>) -> (i32, i32) {
    %c0_i32 = arith.constant 0 : i32
    %c0_i32_0 = arith.constant 0 : i32
    %c0_i32_1 = arith.constant 0 : i32
    return %c0_i32, %c0_i32_0 : i32, i32
  }
  func.func @transform_4(%arg0: i32, %arg1: memref<1xi32, #tpu.memory_space<smem>>) -> (i32, i32) {
    %c0_i32 = arith.constant 0 : i32
    %c0_i32_0 = arith.constant 0 : i32
    %c0_i32_1 = arith.constant 0 : i32
    return %c0_i32, %c0_i32_0 : i32, i32
  }
  func.func @transform_5(%arg0: i32, %arg1: memref<1xi32, #tpu.memory_space<smem>>) -> (i32, i32) {
    %c0_i32 = arith.constant 0 : i32
    %c0_i32_0 = arith.constant 0 : i32
    %c0_i32_1 = arith.constant 0 : i32
    return %c0_i32, %c0_i32_0 : i32, i32
  }
  func.func @transform_6(%arg0: i32, %arg1: memref<1xi32, #tpu.memory_space<smem>>) -> (i32, i32) {
    %c0_i32 = arith.constant 0 : i32
    %c0_i32_0 = arith.constant 0 : i32
    %c0_i32_1 = arith.constant 0 : i32
    return %c0_i32, %c0_i32_0 : i32, i32
  }
  func.func @transform_7(%arg0: i32, %arg1: memref<1xi32, #tpu.memory_space<smem>>) -> (i32, i32) {
    %c0_i32 = arith.constant 0 : i32
    %c0_i32_0 = arith.constant 0 : i32
    return %arg0, %c0_i32 : i32, i32
  }
}

</mosaic_0001>

<bundles_post_ra>
// kernel: tpu_custom_call.1
= control target key start
LH: loop header
LB: loop body
LE: loop exit
PB: predicated region body
PF: predicated region fallthrough
CT: control target
= control target key end

     0   :  { %s357_s0 = inlined_call_operand.<no memory space> [shape: s32[1], index: 0, kind: input, shape index: {}]   ;;  %s358_s1 = inlined_call_operand.vmem [shape: f32[8,2], index: 1, kind: input, shape index: {}]   ;;  %s359_s2 = inlined_call_operand.vmem [shape: f32[2,128], index: 2, kind: input, shape index: {}]   ;;  %s360_s3 = inlined_call_operand.vmem [shape: f32[1,128], index: 3, kind: input, shape index: {}]   ;;  %s361_s4 = inlined_call_operand.hbm [shape: f32[128,128], index: 4, kind: input, shape index: {}]   ;;  %s362_s5 = inlined_call_operand.vmem [shape: f32[1,128], index: 5, kind: input, shape index: {}]   ;;  %s363_s6 = inlined_call_operand.vmem [shape: f32[1,128], index: 6, kind: input, shape index: {}]   ;;  %s364_s7 = inlined_call_operand.<no memory space> [shape: f32[1,1], index: 7, kind: input, shape index: {}]   ;;  %s365_s8 = inlined_call_operand.vmem [shape: f32[8,1], index: 8, kind: output, shape index: {}]  }
   0x1   :  { %v14_v0 = vstv %s364_s7 }
   0x2   :  { %15 = vst [vmem:[#allocation4] sm:$0x1] %v14_v0 }
   0x3   :  { %16 = vsyncpa [#allocation6], 0  ;;  %s281_s28 = smov [#allocation5]  }
   0x4   :  { %s28_s29 = sshll.u32 %s281_s28, 4  ;;  %s29_s29 = int_to_ptr.vmem [resolvable:$true] %s28_s29 }
   0x5   :  { %s267_s30 = scalar_lea.vmem %s29_s29, 2048  ;;  %p272_p1 = scmp.lt.s32.totalorder %s29_s29, %s29_s29 }
   0x6   :  { %p268_p0 = scmp.ne.s32.totalorder %s29_s29, %s267_s30  ;;  %p273_p2 = scmp.lt.s32.totalorder %s267_s30, %s267_s30 }
   0x8   :  { %p274_p3 = por %p273_p2, %p272_p1 }
   0xa   :  { %p275_p4 = pnand %p274_p3, %p268_p0 }
   0xc   :  { %278 = shalt.err (!%p275_p4)
}
   0xd   :  { %s282_s9 = smov 128   ;;  %s283_s10 = smov 8  }
   0xe   :  { %34 = dma.hbm_to_vmem [thread:$0]  %s361_s4, 2048, %s29_s29, [#allocation6], %s282_s9, %s282_s9, %s283_s10  }
   0xf   :  { %279 = dma.done.wait [#allocation6], 2048  }
  0x10   :  { %280 = vsyncadd [#allocation6], 4294965248  ;;  %v284_v1 = vmov 0   ;;  %v285_v2 = vmov 0.0   ;;  %v44_v3 = vld [vmem:[%s358_s1] sm:$0xff]  ;;  %v89_v5 = vld [vmem:[#allocation5 + $0x70] sm:$0xff]  ;;  %v51_v21 = vlaneseq }
  0x11   :  { %257 = vset.pattern.permute.xlu0 %v284_v1  ;;  %215 = vmatprep.subr.mxu0 %v285_v2  ;;  %v90_v4 = vld [vmem:[#allocation5 + $0x78] sm:$0xff]  ;;  %v88_v6 = vld [vmem:[#allocation5 + $0x68] sm:$0xff]  ;;  %v87_v7 = vld [vmem:[#allocation5 + $0x60] sm:$0xff]  ;;  %v286_v8 = vmov 1   ;;  %vm287_vm0 = vmmov 0   ;;  %vm187_vm1 = vcmask 7168  }
  0x12   :  { %48 = vperm.xlu0 %257, %v44_v3   ;;  %216 = vmatpush3.msra.mxu0 %v90_v4  ;;  %v86_v9 = vld [vmem:[#allocation5 + $0x58] sm:$0xff]  ;;  %v85_v10 = vld [vmem:[#allocation5 + $0x50] sm:$0xff]  ;;  %v84_v11 = vld [vmem:[#allocation5 + $0x48] sm:$0xff]  ;;  %v52_v22 = vshrl.u32 %v51_v21, 7 }
  0x13   :  { %217 = vmatprep.subr.mxu0 %v285_v2  ;;  %247 = vmatprep.mubr.msk.f32.mxu0 %vm287_vm0, %v285_v2  ;;  %v83_v12 = vld [vmem:[#allocation5 + $0x40] sm:$0xff]  ;;  %v82_v13 = vld [vmem:[#allocation5 + $0x38] sm:$0xff]  ;;  %v81_v14 = vld [vmem:[#allocation5 + $0x30] sm:$0xff] }
  0x14   :  { %218 = vmatpush3.msra.mxu0 %v89_v5  ;;  %v80_v15 = vld [vmem:[#allocation5 + $0x28] sm:$0xff]  ;;  %v79_v16 = vld [vmem:[#allocation5 + $0x20] sm:$0xff]  ;;  %v78_v17 = vld [vmem:[#allocation5 + $0x18] sm:$0xff]  ;;  %v53_v23 = vsub.s32 0, %v52_v22  ;;  %v62_v24 = vsub.s32 1, %v52_v22 }
  0x15   :  { %219 = vmatprep.subr.mxu0 %v285_v2  ;;  %v77_v18 = vld [vmem:[#allocation5 + $0x10] sm:$0xff]  ;;  %v76_v19 = vld [vmem:[#allocation5 + $0x8] sm:$0xff]  ;;  %v75_v20 = vld [vmem:[#allocation5] sm:$0xff] }
  0x16   :  { %258 = vset.pattern.permute.xlu0 %v286_v8  ;;  %220 = vmatpush3.msra.mxu0 %v88_v6  ;;  %v45_v25 = vld [vmem:[%s359_s2] sm:$0x3] }
  0x17   :  { %57 = vperm.xlu0 %258, %v44_v3   ;;  %221 = vmatprep.subr.mxu0 %v285_v2  ;;  %v54_v27 = vrot.slane %v45_v25, %v53_v23  ;;  %v63_v28 = vrot.slane %v45_v25, %v62_v24  ;;  %v194_v32 = vld [vmem:[%s360_s3] ss:$0 sm:$0xff] }
  0x18   :  { %222 = vmatpush3.msra.mxu0 %v87_v7  ;;  %v195_v36 = vld [vmem:[%s362_s5] ss:$0 sm:$0xff] }
  0x19   :  { %223 = vmatprep.subr.mxu0 %v285_v2  ;;  %v196_v40 = vld [vmem:[%s363_s6] ss:$0 sm:$0xff] }
  0x1a   :  { %224 = vmatpush3.msra.mxu0 %v86_v9  ;;  %v197_v43 = vld [vmem:[#allocation4] ss:$0 sm:$0xff] }
  0x1b   :  { %225 = vmatprep.subr.mxu0 %v285_v2 }
  0x1c   :  { %226 = vmatpush3.msra.mxu0 %v85_v10 }
  0x1d   :  { %227 = vmatprep.subr.mxu0 %v285_v2 }
  0x1e   :  { %228 = vmatpush3.msra.mxu0 %v84_v11 }
  0x1f   :  { %229 = vmatprep.subr.mxu0 %v285_v2 }
  0x20   :  { %230 = vmatpush3.msra.mxu0 %v83_v12 }
  0x21   :  { %231 = vmatprep.subr.mxu0 %v285_v2 }
  0x22   :  { %232 = vmatpush3.msra.mxu0 %v82_v13 }
  0x23   :  { %233 = vmatprep.subr.mxu0 %v285_v2 }
  0x24   :  { %234 = vmatpush3.msra.mxu0 %v81_v14 }
  0x25   :  { %235 = vmatprep.subr.mxu0 %v285_v2 }
  0x26   :  { %236 = vmatpush3.msra.mxu0 %v80_v15 }
  0x27   :  { %237 = vmatprep.subr.mxu0 %v285_v2 }
  0x28   :  { %238 = vmatpush3.msra.mxu0 %v79_v16 }
  0x29   :  { %239 = vmatprep.subr.mxu0 %v285_v2 }
  0x2a   :  { %240 = vmatpush3.msra.mxu0 %v78_v17 }
  0x2b   :  { %241 = vmatprep.subr.mxu0 %v285_v2 }
  0x2c   :  { %242 = vmatpush3.msra.mxu0 %v77_v18 }
  0x2d   :  { %243 = vmatprep.subr.mxu0 %v285_v2 }
  0x2e   :  { %244 = vmatpush3.msra.mxu0 %v76_v19 }
  0x2f   :  { %245 = vmatprep.subr.mxu0 %v285_v2 }
  0x30   :  { %246 = vmatpush3.msra.mxu0 %v75_v20 }
  0x8d   :  { %v49_v26 = vpop.permute.xlu0 %48 }
  0x8e   :  { %v55_v30 = vmul.f32 %v54_v27, %v49_v26 }
  0x92   :  { %v58_v29 = vpop.permute.xlu0 %57 }
  0x93   :  { %v64_v31 = vmul.f32 %v63_v28, %v58_v29 }
  0x95   :  { %v65_v33 = vadd.f32 %v64_v31, %v55_v30 }
  0x97   :  { %v73_v34 = vadd.f32 %v194_v32, %v65_v33 }
  0x99   :  { %v74_v35 = vmax.f32 %v73_v34, 0.0 }
  0x9b   :  { %248 = vmatmul.mubr.f32.vlgmr.msra.gmra.mxu0 %v74_v35 }
 0x15b   :  { %v164_v37 = vpop.f32.mrf.mxu0 }
 0x15c   :  { %v165_v38 = vadd.f32 %v195_v36, %v164_v37 }
 0x15d   :  { %v249_v39 = vpop.f32.mrf.mxu0 }
 0x15e   :  { %v168_v41 = vmax.f32 %v165_v38, 0.0 }
 0x160   :  { %v176_v42 = vmul.f32 %v196_v40, %v168_v41 }
 0x162   :  { %177 = vadd.xlane.f32.xlu1 %v176_v42 }
 0x1eb   :  { %v178_v44 = vpop.xlane.xlu1 %177 }
 0x1ec   :  { %v186_v45 = vadd.f32 %v197_v43, %v178_v44 }
 0x1ee   :  { %188 = vst.msk [vmem:[%s365_s8] sm:$0xff] %vm187_vm1, %v186_v45 }
 0x1ef   :  { %193 = vsyncpa [#allocation6], 1 }

</bundles_post_ra>
